<compile_context>
chip_gen: v7x
topology: tpu7x:2x2x1
jax: 0.10.0
libtpu: 0.0.40
codegen_flags: <defaults>
</compile_context>

<pallas_src>
import math
from functools import partial

import jax
import jax.numpy as jnp
from jax.experimental import pallas as pl
from jax.experimental.pallas import tpu as pltpu

# 2-round integer mixer constants (lowbias32-style); shared by kernel and test.
_H_INIT = 0x9E3779B9
_H_M1 = 0x7FEB352D
_H_M2 = 0x846CA68B


def _pe_table(seq_len, d_model):
    """Pure-JAX sinusoidal table, shape [seq_len, d_model], f32 (matches torch)."""
    position = jnp.arange(seq_len, dtype=jnp.float32)[:, None]                # [S,1]
    div_term = jnp.exp(jnp.arange(0, d_model, 2, dtype=jnp.float32)
                       * (-math.log(10000.0) / d_model))                      # [ceil(D/2)]
    ang = position * div_term                                                 # [S, ceil(D/2)]
    pe = jnp.zeros((seq_len, d_model), dtype=jnp.float32)
    pe = pe.at[:, 0::2].set(jnp.sin(ang))
    pe = pe.at[:, 1::2].set(jnp.cos(ang[:, : d_model // 2]))
    return pe


def _pe_dropout_kernel(seed_ref, *refs, d_model, n_batch, p, training,
                       has_pe_ref, use_hw_prng, compute_dtype):
    if has_pe_ref:
        x_ref, pe_ref, o_ref = refs
    else:
        x_ref, o_ref = refs
        pe_ref = None

    tR, NC = x_ref.shape                       # lane-dense 2D tile: (rows, B*D)
    D = d_model
    base = pl.program_id(0) * tR               # global seq offset of this tile
    cd = compute_dtype

    # ---- positional encoding at (tR, D), then lane-tiled over the batch ----
    if has_pe_ref:
        pe_blk = pe_ref[...]                                               # (tR, D) f32
    else:
        # In-kernel sin path (used for large batch): cos fused via +pi/2 phase.
        d_idx = jax.lax.broadcasted_iota(jnp.int32, (1, D), 1)
        even_k = ((d_idx // 2) * 2).astype(jnp.float32)                    # 0,0,2,2,...
        inv_freq = jnp.exp(even_k * (-math.log(10000.0) / D))              # (1, D)
        phase = (d_idx % 2).astype(jnp.float32) * (0.5 * math.pi)          # (1, D)
        pos = (jax.lax.broadcasted_iota(jnp.int32, (tR, D), 0) + base).astype(jnp.float32)
        pe_blk = jnp.sin(pos * inv_freq + phase)                           # (tR, D)

    pe_blk = pe_blk.astype(cd)
    pe_wide = jnp.tile(pe_blk, (1, n_batch)) if n_batch > 1 else pe_blk    # (tR, B*D)

    y = x_ref[...].astype(cd) + pe_wide

    if training and p > 0.0:
        threshold = jnp.uint32(min(int(round(p * (1 << 32))), (1 << 32) - 1))
        if use_hw_prng:
            # Hardware PRNG: cheapest mask, but not lowerable under the
            # interpret fallback -- enable on real TPU runs.
            pltpu.prng_seed(seed_ref[0] + pl.program_id(0))
            bits = pltpu.bitcast(pltpu.prng_random_bits((tR, NC)), jnp.uint32)
            keep = bits >= threshold
        else:
            # Portable counter hash over the GLOBAL flat element index
            # (tiling-invariant).  Adding the odd constant + seed (not xor)
            # removes the h==0 fixed point of the previous murmur version.
            row = jax.lax.broadcasted_iota(jnp.int32, (tR, NC), 0) + base
            col = jax.lax.broadcasted_iota(jnp.int32, (tR, NC), 1)
            flat = (row * NC + col).astype(jnp.uint32)
            h = flat + seed_ref[0].astype(jnp.uint32) + jnp.uint32(_H_INIT)
            h = h ^ (h >> 16)
            h = h * jnp.uint32(_H_M1)
            h = h ^ (h >> 15)
            h = h * jnp.uint32(_H_M2)
            h = h ^ (h >> 16)
            keep = h >= threshold
        scale = jnp.asarray(1.0 / (1.0 - p), dtype=cd)
        y = jnp.where(keep, y * scale, jnp.zeros_like(y))

    o_ref[...] = y.astype(o_ref.dtype)


def _vmem_limit_bytes():
    """Generation-aware scoped-VMEM limit: ~96 MiB on v5e/v6e (128 MiB phys),
    ~48 MiB on v7x (64 MiB phys); conservative default if the query fails."""
    cap = 64 * 1024 * 1024
    try:
        cap = int(pltpu.get_tpu_info().vmem_capacity_bytes)
    except Exception:
        pass
    return int(min(max((cap * 3) // 4, 32 * 1024 * 1024), 96 * 1024 * 1024))


def _choose_tile_rows(n_rows, n_cols, itemsize, vmem_limit_bytes):
    """Dtype-aware tile size: ~vmem_limit/8 per tile (double-buffered in + out
    + pe + scratch stay well inside the limit); rows rounded to sublane
    multiples; capped so the grid keeps >= 4 steps when there is enough data
    (pipelining depth + work for both v7x TensorCores)."""
    per_tile_budget = max(1 << 20, vmem_limit_bytes // 8)
    row_bytes = max(1, n_cols * itemsize)
    t = max(1, per_tile_budget // row_bytes)
    min_steps = 4
    if n_rows >= min_steps * 8:
        t = min(t, pl.cdiv(n_rows, min_steps))
    if t >= n_rows:
        return n_rows                      # single full-extent tile
    return max(8, (t // 8) * 8)


def _bf16_compute_ok():
    """bf16 VPU compute only on v6e / v7x; v5-class (and unknown) stay f32."""
    try:
        kind = jax.devices()[0].device_kind.lower()
    except Exception:
        return False
    return ("v6" in kind) or ("v7" in kind)


def positional_encoding_1d(x, *, p=0.1, training=False, seed=0,
                           precompute_pe=None, use_hw_prng=False):
    """x: [seq_len, batch, d_model] -> same shape/dtype."""
    assert 0.0 <= p < 1.0, "dropout p must be in [0, 1)"
    S, B, D = x.shape
    NC = B * D
    if precompute_pe is None:
        precompute_pe = B <= 8             # small batch: stream pe, skip in-kernel sin

    vmem_limit = _vmem_limit_bytes()
    tR = _choose_tile_rows(S, NC, x.dtype.itemsize, vmem_limit)
    grid = (pl.cdiv(S, tR),)

    compute_dtype = (jnp.bfloat16
                     if (x.dtype == jnp.bfloat16 and _bf16_compute_ok())
                     else jnp.float32)

    kernel = partial(_pe_dropout_kernel, d_model=D, n_batch=B,
                     p=float(p), training=bool(training),
                     has_pe_ref=bool(precompute_pe),
                     use_hw_prng=bool(use_hw_prng),
                     compute_dtype=compute_dtype)

    seed_arr = jnp.array([seed], dtype=jnp.int32)
    x2 = x.reshape(S, NC)                  # lane-dense view (free: contiguous)

    in_specs = [
        pl.BlockSpec(memory_space=pltpu.MemorySpace.SMEM),   # seed scalar
        pl.BlockSpec((tR, NC), lambda i: (i, 0)),            # x tile
    ]
    args = [seed_arr, x2]
    if precompute_pe:
        in_specs.append(pl.BlockSpec((tR, D), lambda i: (i, 0)))  # pe tile
        args.append(_pe_table(S, D))

    out = pl.pallas_call(
        kernel,
        out_shape=jax.ShapeDtypeStruct((S, NC), x.dtype),
        grid=grid,
        in_specs=in_specs,
        out_specs=pl.BlockSpec((tR, NC), lambda i: (i, 0)),
        compiler_params=pltpu.CompilerParams(
            dimension_semantics=("parallel",),
            vmem_limit_bytes=vmem_limit,
        ),
    )(*args)
    return out.reshape(S, B, D)


# ----------------------------- references / tests -----------------------------

def _reference_eval(x):
    """Pure-JAX reference of eval-mode forward (dropout = identity)."""
    S, _, D = x.shape
    return x + _pe_table(S, D)[:, None, :]


def _expected_keep_mask(shape, seed, p):
    """Pure-JAX replica of the kernel's counter-hash dropout mask (software path)."""
    S, B, D = shape
    flat = jnp.arange(S * B * D, dtype=jnp.int32).astype(jnp.uint32).reshape(S, B, D)
    h = flat + jnp.uint32(seed) + jnp.uint32(_H_INIT)
    h = h ^ (h >> 16)
    h = h * jnp.uint32(_H_M1)
    h = h ^ (h >> 15)
    h = h * jnp.uint32(_H_M2)
    h = h ^ (h >> 16)
    threshold = jnp.uint32(min(int(round(p * (1 << 32))), (1 << 32) - 1))
    return h >= threshold


if __name__ == "__main__":
    seq_len, batch, d_model = 8, 2, 32
    key = jax.random.PRNGKey(0)
    x = jax.random.normal(key, (seq_len, batch, d_model), dtype=jnp.float32)
    y_ref = _reference_eval(x)

    # Eval mode, streamed-pe path (default for small batch).
    y1 = jax.block_until_ready(positional_encoding_1d(x, training=False, precompute_pe=True))
    assert jnp.allclose(y1, y_ref, atol=1e-5, rtol=1e-5), "precomputed-pe path mismatch"

    # Eval mode, in-kernel sin/cos path (used for large batch).
    y2 = jax.block_until_ready(positional_encoding_1d(x, training=False, precompute_pe=False))
    assert jnp.allclose(y2, y_ref, atol=1e-5, rtol=1e-5), "in-kernel pe path mismatch"

    # bf16 input path (bf16 VPU compute on v6e/v7x, f32 compute elsewhere).
    y3 = jax.block_until_ready(positional_encoding_1d(x.astype(jnp.bfloat16), training=False))
    assert y3.shape == x.shape and y3.dtype == jnp.bfloat16
    assert jnp.allclose(y3.astype(jnp.float32), y_ref, atol=1e-1, rtol=5e-2), "bf16 path mismatch"

    # Training mode (p=0.1): exact check against the same hash mask in pure JAX.
    p, seed = 0.1, 0
    y4 = jax.block_until_ready(positional_encoding_1d(x, p=p, training=True, seed=seed))
    keep = _expected_keep_mask((seq_len, batch, d_model), seed, p)
    y4_ref = jnp.where(keep, y_ref * jnp.float32(1.0 / (1.0 - p)), 0.0)
    assert y4.shape == x.shape and y4.dtype == x.dtype
    assert jnp.allclose(y4, y4_ref, atol=1e-5, rtol=1e-5), "dropout mask/scale mismatch"
    keep_frac = float(jnp.mean(keep.astype(jnp.float32)))
    assert 0.8 < keep_frac <= 1.0, "dropout keep fraction implausible"

    print("KERNEL_OK")
</pallas_src>

<mosaic_0001>
module attributes {stable_mosaic.version = 11 : i64} {
  func.func @_pe_dropout_kernel(%arg0: i32, %arg1: memref<1xi32, #tpu.memory_space<smem>>, %arg2: memref<8x64xf32, #tpu.memory_space<vmem>>, %arg3: memref<8x32xf32, #tpu.memory_space<vmem>>, %arg4: memref<8x64xf32, #tpu.memory_space<vmem>>) attributes {dimension_semantics = [#tpu.dimension_semantics<parallel>], iteration_bounds = array<i64: 1>, scalar_prefetch = 0 : i64, scratch_operands = 0 : i64, tpu.core_type = #tpu.core_type<tc>, window_params = [{transform_indices = @transform_0, window_bounds = array<i64: 1>}, {transform_indices = @transform_1, window_bounds = array<i64: 8, 64>}, {transform_indices = @transform_2, window_bounds = array<i64: 8, 32>}, {transform_indices = @transform_3, window_bounds = array<i64: 8, 64>}]} {
    %c0 = arith.constant 0 : index
    %c0_0 = arith.constant 0 : index
    %0 = vector.load %arg3[%c0, %c0_0] : memref<8x32xf32, #tpu.memory_space<vmem>>, vector<8x32xf32>
    %1 = tpu.concatenate %0, %0 in 1 : vector<8x32xf32>, vector<8x32xf32> -> vector<8x64xf32>
    %c0_1 = arith.constant 0 : index
    %c0_2 = arith.constant 0 : index
    %2 = vector.load %arg2[%c0_1, %c0_2] : memref<8x64xf32, #tpu.memory_space<vmem>>, vector<8x64xf32>
    %3 = arith.addf %2, %1 : vector<8x64xf32>
    %c0_3 = arith.constant 0 : index
    %c0_4 = arith.constant 0 : index
    %4 = vector.load %arg4[%c0_3, %c0_4] : memref<8x64xf32, #tpu.memory_space<vmem>>, vector<8x64xf32>
    tpu.vector_store %arg4[%c0_3, %c0_4], %3 {strides = array<i32>} : memref<8x64xf32, #tpu.memory_space<vmem>>, vector<8x64xf32>,
    return
  }
  func.func @transform_0(%arg0: i32) -> i32 {
    %c0_i32 = arith.constant 0 : i32
    %c0_i32_0 = arith.constant 0 : i32
    return %c0_i32 : i32
  }
  func.func @transform_1(%arg0: i32) -> (i32, i32) {
    %c0_i32 = arith.constant 0 : i32
    %c0_i32_0 = arith.constant 0 : i32
    return %arg0, %c0_i32 : i32, i32
  }
  func.func @transform_2(%arg0: i32) -> (i32, i32) {
    %c0_i32 = arith.constant 0 : i32
    %c0_i32_0 = arith.constant 0 : i32
    return %arg0, %c0_i32 : i32, i32
  }
  func.func @transform_3(%arg0: i32) -> (i32, i32) {
    %c0_i32 = arith.constant 0 : i32
    %c0_i32_0 = arith.constant 0 : i32
    return %arg0, %c0_i32 : i32, i32
  }
}

</mosaic_0001>

<bundles_post_ra>
// kernel: tpu_custom_call.1
= control target key start
LH: loop header
LB: loop body
LE: loop exit
PB: predicated region body
PF: predicated region fallthrough
CT: control target
= control target key end

     0   :  { %9 = vsyncpa [#allocation4], 0  ;;  %s203_s0 = inlined_call_operand.<no memory space> [shape: s32[1], index: 0, kind: input, shape index: {}]   ;;  %s204_s1 = inlined_call_operand.hbm [shape: f32[8,64], index: 1, kind: input, shape index: {}]   ;;  %s205_s2 = inlined_call_operand.hbm [shape: f32[8,32], index: 2, kind: input, shape index: {}]   ;;  %s206_s3 = inlined_call_operand.hbm [shape: f32[8,64], index: 3, kind: output, shape index: {}]  }
   0x1   :  { %10 = vsyncpa [#allocation7], 0 }
   0x2   :  { %11 = vsyncpa [#allocation5], 0  ;;  %s143_s12 = smov [#allocation3]   ;;  %s144_s14 = smov [#allocation6]  }
   0x3   :  { %s20_s13 = sshll.u32 %s143_s12, 4  ;;  %s30_s15 = sshll.u32 %s144_s14, 4  ;;  %s21_s13 = int_to_ptr.vmem [resolvable:$true] %s20_s13  ;;  %s31_s15 = int_to_ptr.vmem [resolvable:$true] %s30_s15 }
   0x4   :  { %s71_s17 = scalar_lea.hbm %s204_s1, 128 }
   0x5   :  { %p72_p0 = scmp.ne.s32.totalorder %s204_s1, %s71_s17  ;;  %p75_p1 = scmp.lt.u32.totalorder %s71_s17, %s204_s1 }
   0x7   :  { %p77_p2 = pnand %p75_p1, %p72_p0 }
   0x9   :  { %80 = shalt.err (!%p77_p2)
}
   0xa   :  { %s81_s22 = scalar_lea.vmem %s21_s13, 128  ;;  %p86_p4 = scmp.lt.s32.totalorder %s21_s13, %s21_s13 }
   0xb   :  { %p82_p3 = scmp.ne.s32.totalorder %s21_s13, %s81_s22  ;;  %p87_p5 = scmp.lt.s32.totalorder %s81_s22, %s81_s22 }
   0xd   :  { %p88_p6 = por %p87_p5, %p86_p4 }
   0xf   :  { %p89_p7 = pnand %p88_p6, %p82_p3 }
  0x11   :  { %92 = shalt.err (!%p89_p7)
}
  0x12   :  { %23 = dma.hbm_to_vmem [thread:$0]  %s204_s1, 128, %s21_s13, [#allocation4]  }
  0x13   :  { %s93_s27 = scalar_lea.hbm %s205_s2, 128 }
  0x14   :  { %p94_p8 = scmp.ne.s32.totalorder %s205_s2, %s93_s27  ;;  %p97_p9 = scmp.lt.u32.totalorder %s93_s27, %s205_s2 }
  0x16   :  { %p99_p10 = pnand %p97_p9, %p94_p8 }
  0x18   :  { %102 = shalt.err (!%p99_p10)
}
  0x19   :  { %s103_s5 = scalar_lea.vmem %s31_s15, 128  ;;  %p108_p12 = scmp.lt.s32.totalorder %s31_s15, %s31_s15 }
  0x1a   :  { %p104_p11 = scmp.ne.s32.totalorder %s31_s15, %s103_s5  ;;  %p109_p13 = scmp.lt.s32.totalorder %s103_s5, %s103_s5 }
  0x1c   :  { %p110_p0 = por %p109_p13, %p108_p12 }
  0x1e   :  { %p111_p1 = pnand %p110_p0, %p104_p11 }
  0x20   :  { %114 = shalt.err (!%p111_p1)
}
  0x21   :  { %33 = dma.hbm_to_vmem [thread:$0]  %s205_s2, 128, %s31_s15, [#allocation7]  }
  0x22   :  { %137 = dma.done.wait [#allocation4], 128  }
  0x23   :  { %138 = vsyncadd [#allocation4], 4294967168 }
  0x24   :  { %139 = dma.done.wait [#allocation7], 128  }
  0x25   :  { %140 = vsyncadd [#allocation7], 4294967168  ;;  %v40_v0 = vld [vmem:[#allocation6] sm:$0xff]  ;;  %s145_s7 = smov 32   ;;  %vm45_vm0 = vcmask 261120   ;;  %v47_v1 = vld [vmem:[#allocation3] sm:$0xff] }
  0x26   :  { %42 = vrot.lane.b32.xlu0 %v40_v0, %s145_s7  ;;  %s146_s8 = smov [#allocation8]   ;;  %vm49_vm1 = vcmask 523264  }
  0x27   :  { %s57_s9 = sshll.u32 %s146_s8, 4  ;;  %s58_s9 = int_to_ptr.vmem [resolvable:$true] %s57_s9 }
  0x28   :  { %s115_s10 = scalar_lea.vmem %s58_s9, 128  ;;  %p120_p3 = scmp.lt.s32.totalorder %s58_s9, %s58_s9 }
  0x29   :  { %p116_p2 = scmp.ne.s32.totalorder %s58_s9, %s115_s10  ;;  %p121_p4 = scmp.lt.s32.totalorder %s115_s10, %s115_s10 }
  0x2b   :  { %p122_p5 = por %p121_p4, %p120_p3 }
  0x2d   :  { %p123_p6 = pnand %p122_p5, %p116_p2 }
  0x98   :  { %v43_v2 = vpop.permute.xlu0 %42 }
  0x99   :  { %v46_v3 = vsel %vm45_vm0, %v40_v0, %v43_v2 }
  0x9a   :  { %v48_v4 = vadd.f32 %v47_v1, %v46_v3 }
  0x9c   :  { %50 = vst.msk [vmem:[#allocation8] sm:$0xff] %vm49_vm1, %v48_v4 }
  0x9d   :  { %126 = shalt.err (!%p123_p6)
}
  0x9e   :  { %s127_s12 = scalar_lea.hbm %s206_s3, 128 }
  0x9f   :  { %p128_p7 = scmp.ne.s32.totalorder %s206_s3, %s127_s12  ;;  %p131_p8 = scmp.lt.u32.totalorder %s127_s12, %s206_s3 }
  0xa1   :  { %p133_p9 = pnand %p131_p8, %p128_p7 }
  0xa3   :  { %136 = shalt.err (!%p133_p9)
}
  0xa4   :  { %60 = dma.vmem_to_hbm [thread:$0]  %s58_s9, 128, %s206_s3, [#allocation5]  }
  0xa5   :  { %141 = dma.done.wait [#allocation5], 128  }
  0xa6   :  { %142 = vsyncadd [#allocation5], 4294967168 }
  0xa7   :  { %64 = vsyncpa [#allocation4], 1 }
  0xa8   :  { %65 = vsyncpa [#allocation7], 1 }
  0xa9   :  { %66 = vsyncpa [#allocation5], 1 }

</bundles_post_ra>
